<compile_context>
chip_gen: v6e
topology: v6e:2x2x1
jax: 0.10.0
libtpu: 0.0.40
codegen_flags: <defaults>
</compile_context>

<pallas_src>
import functools

import jax
import jax.numpy as jnp
from jax.experimental import pallas as pl
from jax.experimental.pallas import tpu as pltpu


def _round_up(n, m):
    return ((n + m - 1) // m) * m


def _coupled_kernel(x_ref, w1_ref, b1_ref, wsub_ref, weven_ref, wodd_ref,
                    sw_ref, sub_ref, *, kb):
    f = x_ref.shape[-1]
    t = x_ref[:, f - 1:f]                                  # [TB, 1]  == x[:, -1:]

    # fc1 + tanh for all sub-networks at once (hidden units on lanes).
    h = jnp.tanh(t * w1_ref[...] + b1_ref[...])            # [TB, nw]

    # fc2 of every sub-network folded into one block-diagonal matmul.
    sub = jnp.dot(h, wsub_ref[...],
                  preferred_element_type=jnp.float32)      # [TB, N]
    n1 = jnp.dot(h, weven_ref[...],
                 preferred_element_type=jnp.float32)       # [TB, N//2]  (nets 0,2,4)
    n2 = jnp.dot(h, wodd_ref[...],
                 preferred_element_type=jnp.float32)       # [TB, N//2]  (nets 1,3,5)
    n2 = n2 * n2                                           # net2_out ** 2

    # Pairwise Boltzmann logits + row-normalization.
    logits = jnp.exp(-(n1 - t * n2) / (kb * t))            # [TB, N//2]
    denom = jnp.sum(logits, axis=1, keepdims=True)         # [TB, 1]

    sw_ref[...] = (logits / denom).astype(sw_ref.dtype)
    sub_ref[...] = sub.astype(sub_ref.dtype)


def coupled_model_forward(x, w1, b1, w2, *, kb=1.0, block_b=None):
    """CoupledModel.forward.

    x : [B, F]  (only the last column, T, is used)
    w1, b1, w2 : [num_networks, width]  (fc1.weight.squeeze(-1), fc1.bias,
                                         fc2.weight.squeeze(0) of each Two_NN)
    returns (softmax_weights [B, num_networks//2], sub_network_outputs [B, num_networks])
    """
    assert x.ndim == 2
    assert w1.shape == b1.shape == w2.shape and w1.ndim == 2
    B, F = x.shape
    N, width = w1.shape
    assert N % 2 == 0
    half = N // 2
    nw = N * width

    x = x.astype(jnp.float32)
    w1f = w1.astype(jnp.float32).reshape(1, nw)
    b1f = b1.astype(jnp.float32).reshape(1, nw)

    # Block-diagonal fc2 weights: w2blk[i*width + j, k] = w2[i, j] * (i == k).
    eye = jnp.eye(N, dtype=jnp.float32)
    w2blk = (w2.astype(jnp.float32)[:, :, None] * eye[:, None, :]).reshape(nw, N)
    w_even = w2blk[:, 0::2]                                # [nw, half] -> nets 0,2,4,...
    w_odd = w2blk[:, 1::2]                                 # [nw, half] -> nets 1,3,5,...

    # Batch tile: (8,128)-rule -> second-to-last block dim must be a multiple of 8.
    if block_b is None:
        block_b = min(512, _round_up(B, 8))
    block_b = max(8, _round_up(int(block_b), 8))
    Bp = _round_up(B, block_b)
    if Bp != B:
        # Pad with T = 1.0 so padded rows stay finite; they are sliced off below.
        pad = jnp.ones((Bp - B, F), dtype=x.dtype)
        x = jnp.concatenate([x, pad], axis=0)
    nb = Bp // block_b

    kernel = functools.partial(_coupled_kernel, kb=float(kb))

    cost = pl.CostEstimate(
        flops=Bp * (2 * nw + 2 * nw * (N + 2 * half) + 10 * half),
        transcendentals=Bp * (nw + half),          # tanh per hidden unit + exp per pair
        bytes_accessed=4 * (Bp * F + nw * (2 + N + 2 * half) + Bp * (N + half)),
    )

    sw_p, sub_p = pl.pallas_call(
        kernel,
        out_shape=(jax.ShapeDtypeStruct((Bp, half), jnp.float32),
                   jax.ShapeDtypeStruct((Bp, N), jnp.float32)),
        grid_spec=pltpu.PrefetchScalarGridSpec(
            num_scalar_prefetch=0,
            grid=(nb,),
            in_specs=[
                pl.BlockSpec((block_b, F), lambda i: (i, 0)),
                pl.BlockSpec((1, nw), lambda i: (0, 0)),
                pl.BlockSpec((1, nw), lambda i: (0, 0)),
                pl.BlockSpec((nw, N), lambda i: (0, 0)),
                pl.BlockSpec((nw, half), lambda i: (0, 0)),
                pl.BlockSpec((nw, half), lambda i: (0, 0)),
            ],
            out_specs=(
                pl.BlockSpec((block_b, half), lambda i: (i, 0)),
                pl.BlockSpec((block_b, N), lambda i: (i, 0)),
            ),
        ),
        compiler_params=pltpu.CompilerParams(
            dimension_semantics=("parallel",),
        ),
        cost_estimate=cost,
    )(x, w1f, b1f, w2blk, w_even, w_odd)

    return sw_p[:B], sub_p[:B]


def coupled_model_ref(x, w1, b1, w2, *, kb=1.0):
    """Pure-JAX reference matching the PyTorch CoupledModel.forward."""
    t = x[:, -1:].astype(jnp.float32)
    N = w1.shape[0]
    outs = []
    for i in range(N):
        h = jnp.tanh(t * w1[i][None, :] + b1[i][None, :])          # fc1 + tanh
        outs.append(jnp.sum(h * w2[i][None, :], axis=1, keepdims=True))  # fc2 (no bias)
    sub = jnp.concatenate(outs, axis=1)
    logits = []
    for i in range(N // 2):
        n1 = outs[2 * i]
        n2 = outs[2 * i + 1] ** 2
        logits.append(jnp.exp(-(n1 - t * n2) / (kb * t)))
    logits = jnp.concatenate(logits, axis=1)
    sw = logits / jnp.sum(logits, axis=1, keepdims=True)
    return sw, sub


if __name__ == "__main__":
    key = jax.random.PRNGKey(0)
    kx, k1, k2, k3 = jax.random.split(key, 4)

    Nf = 100            # batch (number of temperatures), as in the module
    width = 8           # Two_NN hidden width
    num_networks = 6
    kb = 1.0

    # T = linspace(Tmin=1, Tmax=8, Nf) as the last column of x
    T = jnp.linspace(1.0, 8.0, Nf).reshape(Nf, 1).astype(jnp.float32)
    extra = jax.random.normal(kx, (Nf, 1), dtype=jnp.float32)   # unused column
    x = jnp.concatenate([extra, T], axis=1)                     # [100, 2]

    # Deterministic Two_NN parameters for all 6 sub-networks.
    w1 = jax.random.normal(k1, (num_networks, width), dtype=jnp.float32)
    b1 = 0.5 * jax.random.normal(k2, (num_networks, width), dtype=jnp.float32)
    w2 = jax.random.normal(k3, (num_networks, width), dtype=jnp.float32) / jnp.sqrt(width)

    sw, sub = coupled_model_forward(x, w1, b1, w2, kb=kb)
    jax.block_until_ready((sw, sub))

    sw_ref, sub_ref = coupled_model_ref(x, w1, b1, w2, kb=kb)

    assert sw.shape == (Nf, num_networks // 2), sw.shape
    assert sub.shape == (Nf, num_networks), sub.shape
    assert jnp.allclose(sub, sub_ref, rtol=1e-5, atol=1e-5), (
        float(jnp.max(jnp.abs(sub - sub_ref))))
    assert jnp.allclose(sw, sw_ref, rtol=1e-5, atol=1e-5), (
        float(jnp.max(jnp.abs(sw - sw_ref))))
    assert jnp.allclose(jnp.sum(sw, axis=1), 1.0, rtol=1e-5, atol=1e-5)

    print("KERNEL_OK")
</pallas_src>

<mosaic_0001>
module attributes {stable_mosaic.version = 11 : i64} {
  func.func @_coupled_kernel(%arg0: i32, %arg1: memref<104x2xf32, #tpu.memory_space<vmem>>, %arg2: memref<1x48xf32, #tpu.memory_space<vmem>>, %arg3: memref<1x48xf32, #tpu.memory_space<vmem>>, %arg4: memref<48x6xf32, #tpu.memory_space<vmem>>, %arg5: memref<48x3xf32, #tpu.memory_space<vmem>>, %arg6: memref<48x3xf32, #tpu.memory_space<vmem>>, %arg7: memref<104x3xf32, #tpu.memory_space<vmem>>, %arg8: memref<104x6xf32, #tpu.memory_space<vmem>>) attributes {dimension_semantics = [#tpu.dimension_semantics<parallel>], iteration_bounds = array<i64: 1>, scalar_prefetch = 0 : i64, scratch_operands = 0 : i64, tpu.core_type = #tpu.core_type<tc>, window_params = [{transform_indices = @transform_0, window_bounds = array<i64: 104, 2>}, {pipeline_mode = #tpu.pipeline_mode<synchronous>, transform_indices = @transform_1, window_bounds = array<i64: 1, 48>}, {pipeline_mode = #tpu.pipeline_mode<synchronous>, transform_indices = @transform_2, window_bounds = array<i64: 1, 48>}, {pipeline_mode = #tpu.pipeline_mode<synchronous>, transform_indices = @transform_3, window_bounds = array<i64: 48, 6>}, {pipeline_mode = #tpu.pipeline_mode<synchronous>, transform_indices = @transform_4, window_bounds = array<i64: 48, 3>}, {pipeline_mode = #tpu.pipeline_mode<synchronous>, transform_indices = @transform_5, window_bounds = array<i64: 48, 3>}, {transform_indices = @transform_6, window_bounds = array<i64: 104, 3>}, {transform_indices = @transform_7, window_bounds = array<i64: 104, 6>}]} {
    %c0 = arith.constant 0 : index
    %c1 = arith.constant 1 : index
    %0 = vector.load %arg1[%c0, %c1] : memref<104x2xf32, #tpu.memory_space<vmem>>, vector<104x1xf32>
    %c0_0 = arith.constant 0 : index
    %c0_1 = arith.constant 0 : index
    %1 = vector.load %arg2[%c0_0, %c0_1] : memref<1x48xf32, #tpu.memory_space<vmem>>, vector<1x48xf32>
    %2 = vector.broadcast %0 : vector<104x1xf32> to vector<104x48xf32>
    %3 = vector.broadcast %1 : vector<1x48xf32> to vector<104x48xf32>
    %4 = arith.mulf %2, %3 : vector<104x48xf32>
    %c0_2 = arith.constant 0 : index
    %c0_3 = arith.constant 0 : index
    %5 = vector.load %arg3[%c0_2, %c0_3] : memref<1x48xf32, #tpu.memory_space<vmem>>, vector<1x48xf32>
    %6 = vector.broadcast %5 : vector<1x48xf32> to vector<104x48xf32>
    %7 = arith.addf %4, %6 : vector<104x48xf32>
    %8 = math.tanh %7 : vector<104x48xf32>
    %c0_4 = arith.constant 0 : index
    %c0_5 = arith.constant 0 : index
    %9 = vector.load %arg4[%c0_4, %c0_5] : memref<48x6xf32, #tpu.memory_space<vmem>>, vector<48x6xf32>
    %cst = arith.constant dense<0.000000e+00> : vector<104x6xf32>
    %10 = tpu.matmul %8, %9, %cst {dimension_numbers = #tpu.dot_dimension_numbers<[1], [0], [0], [1], [0, 0, 1, 1], [], []>} : vector<104x48xf32>, vector<48x6xf32>, vector<104x6xf32> -> vector<104x6xf32>
    %c0_6 = arith.constant 0 : index
    %c0_7 = arith.constant 0 : index
    %11 = vector.load %arg5[%c0_6, %c0_7] : memref<48x3xf32, #tpu.memory_space<vmem>>, vector<48x3xf32>
    %cst_8 = arith.constant dense<0.000000e+00> : vector<104x3xf32>
    %12 = tpu.matmul %8, %11, %cst_8 {dimension_numbers = #tpu.dot_dimension_numbers<[1], [0], [0], [1], [0, 0, 1, 1], [], []>} : vector<104x48xf32>, vector<48x3xf32>, vector<104x3xf32> -> vector<104x3xf32>
    %c0_9 = arith.constant 0 : index
    %c0_10 = arith.constant 0 : index
    %13 = vector.load %arg6[%c0_9, %c0_10] : memref<48x3xf32, #tpu.memory_space<vmem>>, vector<48x3xf32>
    %cst_11 = arith.constant dense<0.000000e+00> : vector<104x3xf32>
    %14 = tpu.matmul %8, %13, %cst_11 {dimension_numbers = #tpu.dot_dimension_numbers<[1], [0], [0], [1], [0, 0, 1, 1], [], []>} : vector<104x48xf32>, vector<48x3xf32>, vector<104x3xf32> -> vector<104x3xf32>
    %15 = arith.mulf %14, %14 : vector<104x3xf32>
    %16 = vector.broadcast %0 : vector<104x1xf32> to vector<104x3xf32>
    %17 = arith.mulf %16, %15 : vector<104x3xf32>
    %18 = arith.subf %12, %17 : vector<104x3xf32>
    %cst_12 = arith.constant 0.000000e+00 : f32
    %19 = vector.broadcast %cst_12 : f32 to vector<104x3xf32>
    %20 = arith.subf %19, %18 : vector<104x3xf32>
    %cst_13 = arith.constant 1.000000e+00 : f32
    %21 = vector.broadcast %cst_13 : f32 to vector<104x1xf32>
    %22 = arith.mulf %21, %0 : vector<104x1xf32>
    %23 = vector.broadcast %22 : vector<104x1xf32> to vector<104x3xf32>
    %24 = arith.divf %20, %23 : vector<104x3xf32>
    %25 = math.exp %24 : vector<104x3xf32>
    %cst_14 = arith.constant dense<0.000000e+00> : vector<104xf32>
    %26 = vector.multi_reduction <add>, %25, %cst_14 [1] : vector<104x3xf32> to vector<104xf32>
    %27 = vector.shape_cast %26 : vector<104xf32> to vector<104x1xf32>
    %28 = vector.broadcast %27 : vector<104x1xf32> to vector<104x3xf32>
    %29 = arith.divf %25, %28 : vector<104x3xf32>
    %c0_15 = arith.constant 0 : index
    %c0_16 = arith.constant 0 : index
    %30 = vector.load %arg7[%c0_15, %c0_16] : memref<104x3xf32, #tpu.memory_space<vmem>>, vector<104x3xf32>
    tpu.vector_store %arg7[%c0_15, %c0_16], %29 {strides = array<i32>} : memref<104x3xf32, #tpu.memory_space<vmem>>, vector<104x3xf32>,
    %c0_17 = arith.constant 0 : index
    %c0_18 = arith.constant 0 : index
    %31 = vector.load %arg8[%c0_17, %c0_18] : memref<104x6xf32, #tpu.memory_space<vmem>>, vector<104x6xf32>
    tpu.vector_store %arg8[%c0_17, %c0_18], %10 {strides = array<i32>} : memref<104x6xf32, #tpu.memory_space<vmem>>, vector<104x6xf32>,
    return
  }
  func.func @transform_0(%arg0: i32) -> (i32, i32) {
    %c0_i32 = arith.constant 0 : i32
    %c0_i32_0 = arith.constant 0 : i32
    return %arg0, %c0_i32 : i32, i32
  }
  func.func @transform_1(%arg0: i32) -> (i32, i32) {
    %c0_i32 = arith.constant 0 : i32
    %c0_i32_0 = arith.constant 0 : i32
    %c0_i32_1 = arith.constant 0 : i32
    return %c0_i32, %c0_i32_0 : i32, i32
  }
  func.func @transform_2(%arg0: i32) -> (i32, i32) {
    %c0_i32 = arith.constant 0 : i32
    %c0_i32_0 = arith.constant 0 : i32
    %c0_i32_1 = arith.constant 0 : i32
    return %c0_i32, %c0_i32_0 : i32, i32
  }
  func.func @transform_3(%arg0: i32) -> (i32, i32) {
    %c0_i32 = arith.constant 0 : i32
    %c0_i32_0 = arith.constant 0 : i32
    %c0_i32_1 = arith.constant 0 : i32
    return %c0_i32, %c0_i32_0 : i32, i32
  }
  func.func @transform_4(%arg0: i32) -> (i32, i32) {
    %c0_i32 = arith.constant 0 : i32
    %c0_i32_0 = arith.constant 0 : i32
    %c0_i32_1 = arith.constant 0 : i32
    return %c0_i32, %c0_i32_0 : i32, i32
  }
  func.func @transform_5(%arg0: i32) -> (i32, i32) {
    %c0_i32 = arith.constant 0 : i32
    %c0_i32_0 = arith.constant 0 : i32
    %c0_i32_1 = arith.constant 0 : i32
    return %c0_i32, %c0_i32_0 : i32, i32
  }
  func.func @transform_6(%arg0: i32) -> (i32, i32) {
    %c0_i32 = arith.constant 0 : i32
    %c0_i32_0 = arith.constant 0 : i32
    return %arg0, %c0_i32 : i32, i32
  }
  func.func @transform_7(%arg0: i32) -> (i32, i32) {
    %c0_i32 = arith.constant 0 : i32
    %c0_i32_0 = arith.constant 0 : i32
    return %arg0, %c0_i32 : i32, i32
  }
}

</mosaic_0001>

<bundles_post_ra>
// kernel: tpu_custom_call.1
= control target key start
LH: loop header
LB: loop body
LE: loop exit
PB: predicated region body
PF: predicated region fallthrough
CT: control target
= control target key end

     0   :  { %v1181_v0 = vmov 1   ;;  %v1182_v7 = vmov 0.0   ;;  %vm1183_vm0 = vmmov 0   ;;  %vm162_vm1 = vcmask 392192   ;;  %s1768_s0 = inlined_call_operand.vmem [shape: f32[104,2], index: 0, kind: input, shape index: {}]   ;;  %s1769_s3 = inlined_call_operand.vmem [shape: f32[48,6], index: 3, kind: input, shape index: {}]   ;;  %s1770_s1 = inlined_call_operand.vmem [shape: f32[1,48], index: 1, kind: input, shape index: {}]   ;;  %s1771_s2 = inlined_call_operand.vmem [shape: f32[1,48], index: 2, kind: input, shape index: {}]   ;;  %s1772_s5 = inlined_call_operand.vmem [shape: f32[48,3], index: 5, kind: input, shape index: {}]   ;;  %s1773_s4 = inlined_call_operand.vmem [shape: f32[48,3], index: 4, kind: input, shape index: {}]   ;;  %s1774_s7 = inlined_call_operand.vmem [shape: f32[104,6], index: 7, kind: output, shape index: {1}]   ;;  %s1775_s6 = inlined_call_operand.vmem [shape: f32[104,3], index: 6, kind: output, shape index: {0}]  }
   0x1   :  { %1076 = vset.pattern.permute.xlu1 %v1181_v0  ;;  %1075 = vset.pattern.permute.xlu0 %v1181_v0  ;;  %v27_v1 = vld [vmem:[%s1768_s0 + $0x10] sm:$0xff]  ;;  %v25_v2 = vld [vmem:[%s1768_s0] sm:$0xff]  ;;  %v32_v3 = vld [vmem:[%s1768_s0 + $0x38] sm:$0xff]  ;;  %vm787_vm2 = vcmask 48128   ;;  %vm708_vm3 = vcmask 23552  }
   0x2   :  { %51 = vperm.xlu1 %1076, %v27_v1   ;;  %41 = vperm.xlu0 %1075, %v25_v2   ;;  %v26_v4 = vld [vmem:[%s1768_s0 + $0x8] sm:$0xff]  ;;  %v33_v5 = vld [vmem:[%s1768_s0 + $0x40] sm:$0xff]  ;;  %v28_v6 = vld [vmem:[%s1768_s0 + $0x18] sm:$0xff] }
   0x3   :  { %907 = vmatprep.subr.mxu0 %v1182_v7  ;;  %v161_v8 = vld [vmem:[%s1769_s3 + $0x28] sm:$0xff]  ;;  %1060 = vmatprep.subr.mxu1 %v1182_v7  ;;  %v160_v9 = vld [vmem:[%s1769_s3 + $0x20] sm:$0xff]  ;;  %v159_v12 = vld [vmem:[%s1769_s3 + $0x18] sm:$0xff] }
   0x4   :  { %908 = vmatpush3.msra.mxu0 %v161_v8  ;;  %1066 = vmatpush3.msra.mxu1 %v161_v8  ;;  %v34_v10 = vld [vmem:[%s1768_s0 + $0x48] sm:$0xff]  ;;  %v29_v11 = vld [vmem:[%s1768_s0 + $0x20] sm:$0xff]  ;;  %v158_v13 = vld [vmem:[%s1769_s3 + $0x10] sm:$0xff] }
   0x5   :  { %909 = vmatprep.subr.mxu0 %v1182_v7  ;;  %1061 = vmatprep.subr.mxu1 %v1182_v7  ;;  %v35_v14 = vld [vmem:[%s1768_s0 + $0x50] sm:$0xff]  ;;  %v30_v15 = vld [vmem:[%s1768_s0 + $0x28] sm:$0xff]  ;;  %v156_v17 = vld [vmem:[%s1769_s3] sm:$0xff] }
   0x6   :  { %76 = vperm.xlu1 %1076, %v32_v3   ;;  %46 = vperm.xlu0 %1075, %v26_v4   ;;  %v157_v16 = vld [vmem:[%s1769_s3 + $0x8] sm:$0xff]  ;;  %v36_v18 = vld [vmem:[%s1768_s0 + $0x58] sm:$0xff]  ;;  %v31_v19 = vld [vmem:[%s1768_s0 + $0x30] sm:$0xff] }
   0x7   :  { %910 = vmatpush3.msra.mxu0 %v160_v9  ;;  %1067 = vmatpush3.msra.mxu1 %v160_v9  ;;  %v37_v20 = vld [vmem:[%s1768_s0 + $0x60] sm:$0xff]  ;;  %v473_v51 = vld [vmem:[%s1772_s5 + $0x28] sm:$0xff]  ;;  %v471_v1 = vld [vmem:[%s1772_s5 + $0x18] sm:$0xff] }
   0x8   :  { %911 = vmatprep.subr.mxu0 %v1182_v7  ;;  %1062 = vmatprep.subr.mxu1 %v1182_v7  ;;  %v1302_v21 = vld [vmem:[%s1770_s1] ss:$0 sm:$0xff]  ;;  %v337_v61 = vld [vmem:[%s1773_s4 + $0x28] sm:$0xff]  ;;  %v470_v9 = vld [vmem:[%s1772_s5 + $0x10] sm:$0xff] }
   0x9   :  { %912 = vmatpush3.msra.mxu0 %v159_v12  ;;  %1068 = vmatpush3.msra.mxu1 %v159_v12  ;;  %v1307_v22 = vld [vmem:[%s1771_s2] ss:$0 sm:$0xff] }
   0xa   :  { %81 = vperm.xlu1 %1076, %v33_v5   ;;  %56 = vperm.xlu0 %1075, %v28_v6   ;;  %v472_v56 = vld [vmem:[%s1772_s5 + $0x20] sm:$0xff] }
   0xb   :  { %913 = vmatprep.subr.mxu0 %v1182_v7  ;;  %1063 = vmatprep.subr.mxu1 %v1182_v7  ;;  %v336_v5 = vld [vmem:[%s1773_s4 + $0x20] sm:$0xff] }
   0xc   :  { %914 = vmatpush3.msra.mxu0 %v158_v13  ;;  %1069 = vmatpush3.msra.mxu1 %v158_v13  ;;  %v469_v13 = vld [vmem:[%s1772_s5 + $0x8] sm:$0xff] }
   0xd   :  { %915 = vmatprep.subr.mxu0 %v1182_v7  ;;  %1064 = vmatprep.subr.mxu1 %v1182_v7 }
   0xe   :  { %86 = vperm.xlu1 %1076, %v34_v10   ;;  %61 = vperm.xlu0 %1075, %v29_v11   ;;  %v335_v11 = vld [vmem:[%s1773_s4 + $0x18] sm:$0xff] }
   0xf   :  { %916 = vmatpush3.msra.mxu0 %v157_v16  ;;  %919 = vmatprep.mubr.msk.f32.mxu0 %vm1183_vm0, %v1182_v7 }
  0x10   :  { %917 = vmatprep.subr.mxu0 %v1182_v7  ;;  %1070 = vmatpush3.msra.mxu1 %v157_v16 }
  0x11   :  { %918 = vmatpush3.msra.mxu0 %v156_v17  ;;  %1065 = vmatprep.subr.mxu1 %v1182_v7 }
  0x12   :  { %91 = vperm.xlu1 %1076, %v35_v14   ;;  %66 = vperm.xlu0 %1075, %v30_v15   ;;  %v334_v15 = vld [vmem:[%s1773_s4 + $0x10] sm:$0xff] }
  0x13   :  { %1009 = vmatprep.subr.mxu0 %v1182_v7  ;;  %1071 = vmatpush3.msra.mxu1 %v156_v17  ;;  %v468_v17 = vld [vmem:[%s1772_s5] sm:$0xff] }
  0x14   :  { %940 = vmatprep.mubr.msk.f32.mxu1 %vm1183_vm0, %v1182_v7  ;;  %958 = vmatprep.subr.mxu1 %v1182_v7 }
  0x16   :  { %96 = vperm.xlu1 %1076, %v36_v18   ;;  %71 = vperm.xlu0 %1075, %v31_v19   ;;  %v333_v19 = vld [vmem:[%s1773_s4 + $0x8] sm:$0xff] }
  0x1a   :  { %101 = vperm.xlu0 %1075, %v37_v20  }
  0x7d   :  { %v1309_v23 = vpop.permute.xlu1 %51  ;;  %v1311_v24 = vpop.permute.xlu0 %41 }
  0x7e   :  { %v110_v25 = vmul.f32 %v1302_v21, %v1311_v24  ;;  %v112_v31 = vmul.f32 %v1302_v21, %v1309_v23 }
  0x80   :  { %v130_v26 = vadd.f32 %v1307_v22, %v110_v25  ;;  %v132_v37 = vadd.f32 %v1307_v22, %v112_v31 }
  0x81   :  { %v1316_v27 = vpop.permute.xlu1 %76  ;;  %v1318_v28 = vpop.permute.xlu0 %46 }
  0x82   :  { %v117_v29 = vmul.f32 %v1302_v21, %v1316_v27  ;;  %v111_v30 = vmul.f32 %v1302_v21, %v1318_v28  ;;  %1077 = vtanh.f32 %v130_v26 }
  0x84   :  { %v137_v32 = vadd.f32 %v1307_v22, %v117_v29  ;;  %v131_v33 = vadd.f32 %v1307_v22, %v111_v30 }
  0x85   :  { %v1328_v34 = vpop.permute.xlu1 %81  ;;  %v1330_v35 = vpop.permute.xlu0 %56 }
  0x86   :  { %1079 = vtanh.f32 %v137_v32  ;;  %v118_v36 = vmul.f32 %v1302_v21, %v1328_v34  ;;  %v113_v38 = vmul.f32 %v1302_v21, %v1330_v35 }
  0x87   :  { %1081 = vtanh.f32 %v131_v33 }
  0x88   :  { %v138_v39 = vadd.f32 %v1307_v22, %v118_v36  ;;  %v133_v43 = vadd.f32 %v1307_v22, %v113_v38 }
  0x89   :  { %v1338_v40 = vpop.permute.xlu1 %86  ;;  %v1340_v41 = vpop.permute.xlu0 %61 }
  0x8a   :  { %1083 = vtanh.f32 %v138_v39  ;;  %v119_v42 = vmul.f32 %v1302_v21, %v1338_v40  ;;  %v114_v44 = vmul.f32 %v1302_v21, %v1340_v41 }
  0x8b   :  { %1085 = vtanh.f32 %v132_v37 }
  0x8c   :  { %v139_v45 = vadd.f32 %v1307_v22, %v119_v42  ;;  %v134_v49 = vadd.f32 %v1307_v22, %v114_v44 }
  0x8d   :  { %v1348_v46 = vpop.permute.xlu1 %91  ;;  %v1350_v47 = vpop.permute.xlu0 %66 }
  0x8e   :  { %1087 = vtanh.f32 %v139_v45  ;;  %v120_v48 = vmul.f32 %v1302_v21, %v1348_v46  ;;  %v115_v50 = vmul.f32 %v1302_v21, %v1350_v47 }
  0x8f   :  { %1089 = vtanh.f32 %v133_v43  ;;  %v1360_v52 = vpop.eup %1077 }
  0x90   :  { %v140_v53 = vadd.f32 %v1307_v22, %v120_v48  ;;  %920 = vmatmul.mubr.msk.f32.vlgmr.msra.gmra.mxu0 %vm162_vm1, %v1360_v52  ;;  %v135_v59 = vadd.f32 %v1307_v22, %v115_v50 }
  0x91   :  { %v1365_v54 = vpop.permute.xlu1 %96  ;;  %v1367_v55 = vpop.permute.xlu0 %71  ;;  %1010 = vmatpush3.msra.mxu0 %v473_v51  ;;  %922 = vmatprep.mubr.msk.f32.mxu0 %vm1183_vm0, %v1182_v7 }
  0x92   :  { %1091 = vtanh.f32 %v140_v53  ;;  %v121_v57 = vmul.f32 %v1302_v21, %v1365_v54  ;;  %v116_v60 = vmul.f32 %v1302_v21, %v1367_v55  ;;  %1011 = vmatprep.subr.mxu0 %v1182_v7 }
  0x93   :  { %v1376_v58 = vpop.eup %1079  ;;  %1093 = vtanh.f32 %v134_v49  ;;  %1012 = vmatpush3.msra.mxu0 %v472_v56 }
  0x94   :  { %v1385_v62 = vpop.eup %1081  ;;  %v141_v63 = vadd.f32 %v1307_v22, %v121_v57  ;;  %941 = vmatmul.mubr.msk.f32.vlgmr.msra.gmra.mxu1 %vm162_vm1, %v1376_v58  ;;  %v136_v4 = vadd.f32 %v1307_v22, %v116_v60  ;;  %1013 = vmatprep.subr.mxu0 %v1182_v7 }
  0x95   :  { %923 = vmatmul.mubr.msk.f32.gmra.mxu0 %vm162_vm1, %v1385_v62  ;;  %v1392_v0 = vpop.permute.xlu0 %101  ;;  %943 = vmatprep.mubr.msk.f32.mxu1 %vm1183_vm0, %v1182_v7 }
  0x96   :  { %1095 = vtanh.f32 %v141_v63  ;;  %v122_v2 = vmul.f32 %v1302_v21, %v1392_v0  ;;  %925 = vmatprep.mubr.msk.f32.mxu0 %vm1183_vm0, %v1182_v7  ;;  %959 = vmatpush3.msra.mxu1 %v337_v61  ;;  %v332_v21 = vld [vmem:[%s1773_s4] sm:$0xff] }
  0x97   :  { %v1403_v3 = vpop.eup %1083  ;;  %1097 = vtanh.f32 %v135_v59  ;;  %960 = vmatprep.subr.mxu1 %v1182_v7  ;;  %1014 = vmatpush3.msra.mxu0 %v471_v1 }
  0x98   :  { %v1411_v6 = vpop.eup %1085  ;;  %v142_v8 = vadd.f32 %v1307_v22, %v122_v2  ;;  %944 = vmatmul.mubr.msk.f32.gmra.mxu1 %vm162_vm1, %v1403_v3  ;;  %1015 = vmatprep.subr.mxu0 %v1182_v7 }
  0x99   :  { %926 = vmatmul.mubr.msk.f32.gmra.mxu0 %vm162_vm1, %v1411_v6  ;;  %946 = vmatprep.mubr.msk.f32.mxu1 %vm1183_vm0, %v1182_v7 }
  0x9a   :  { %1099 = vtanh.f32 %v142_v8  ;;  %928 = vmatprep.mubr.msk.f32.mxu0 %vm1183_vm0, %v1182_v7  ;;  %961 = vmatpush3.msra.mxu1 %v336_v5 }
  0x9b   :  { %v1425_v10 = vpop.eup %1087  ;;  %1101 = vtanh.f32 %v136_v4  ;;  %962 = vmatprep.subr.mxu1 %v1182_v7  ;;  %1016 = vmatpush3.msra.mxu0 %v470_v9 }
  0x9c   :  { %v1090_v12 = vpop.eup %1089  ;;  %947 = vmatmul.mubr.msk.f32.gmra.mxu1 %vm162_vm1, %v1425_v10  ;;  %1017 = vmatprep.subr.mxu0 %v1182_v7  ;;  %1103 = vrcp.f32 %v1311_v24 }
  0x9d   :  { %929 = vmatmul.mubr.msk.f32.gmra.mxu0 %vm162_vm1, %v1090_v12  ;;  %949 = vmatprep.mubr.msk.f32.mxu1 %vm1183_vm0, %v1182_v7  ;;  %1105 = vrcp.f32 %v1318_v28 }
  0x9e   :  { %931 = vmatprep.mubr.msk.f32.mxu0 %vm1183_vm0, %v1182_v7  ;;  %963 = vmatpush3.msra.mxu1 %v335_v11  ;;  %1107 = vrcp.f32 %v1309_v23 }
  0x9f   :  { %v1442_v14 = vpop.eup %1091  ;;  %964 = vmatprep.subr.mxu1 %v1182_v7  ;;  %1018 = vmatpush3.msra.mxu0 %v469_v13  ;;  %1109 = vrcp.f32 %v1330_v35 }
  0xa0   :  { %v1094_v16 = vpop.eup %1093  ;;  %950 = vmatmul.mubr.msk.f32.gmra.mxu1 %vm162_vm1, %v1442_v14  ;;  %1019 = vmatprep.subr.mxu0 %v1182_v7  ;;  %1111 = vrcp.f32 %v1340_v41 }
  0xa1   :  { %932 = vmatmul.mubr.msk.f32.gmra.mxu0 %vm162_vm1, %v1094_v16  ;;  %952 = vmatprep.mubr.msk.f32.mxu1 %vm1183_vm0, %v1182_v7 }
  0xa2   :  { %934 = vmatprep.mubr.msk.f32.mxu0 %vm1183_vm0, %v1182_v7  ;;  %965 = vmatpush3.msra.mxu1 %v334_v15 }
  0xa3   :  { %v1459_v18 = vpop.eup %1095  ;;  %966 = vmatprep.subr.mxu1 %v1182_v7  ;;  %1020 = vmatpush3.msra.mxu0 %v468_v17 }
  0xa4   :  { %v1098_v20 = vpop.eup %1097  ;;  %953 = vmatmul.mubr.msk.f32.gmra.mxu1 %vm162_vm1, %v1459_v18 }
  0xa5   :  { %935 = vmatmul.mubr.msk.f32.gmra.mxu0 %vm162_vm1, %v1098_v20  ;;  %955 = vmatprep.mubr.msk.f32.mxu1 %vm1183_vm0, %v1182_v7 }
  0xa6   :  { %937 = vmatprep.mubr.msk.f32.mxu0 %vm1183_vm0, %v1182_v7  ;;  %967 = vmatpush3.msra.mxu1 %v333_v19 }
  0xa7   :  { %v1100_v22 = vpop.eup %1099  ;;  %968 = vmatprep.subr.mxu1 %v1182_v7 }
  0xa8   :  { %v1102_v25 = vpop.eup %1101  ;;  %956 = vmatmul.mubr.msk.f32.gmra.mxu1 %vm162_vm1, %v1100_v22 }
  0xa9   :  { %938 = vmatmul.mubr.msk.f32.gmra.mxu0 %vm162_vm1, %v1102_v25  ;;  %969 = vmatpush3.msra.mxu1 %v332_v21 }
  0xaa   :  { %970 = vmatprep.mubr.msk.f32.mxu1 %vm1183_vm0, %v1182_v7  ;;  %1021 = vmatprep.mubr.msk.f32.mxu0 %vm1183_vm0, %v1182_v7 }
  0xac   :  { %971 = vmatmul.mubr.msk.f32.vlgmr.msra.gmra.mxu1 %vm162_vm1, %v1360_v52 }
  0xad   :  { %1022 = vmatmul.mubr.msk.f32.vlgmr.msra.gmra.mxu0 %vm162_vm1, %v1360_v52  ;;  %973 = vmatprep.mubr.msk.f32.mxu1 %vm1183_vm0, %v1182_v7 }
  0xae   :  { %1024 = vmatprep.mubr.msk.f32.mxu0 %vm1183_vm0, %v1182_v7 }
  0xb0   :  { %974 = vmatmul.mubr.msk.f32.gmra.mxu1 %vm162_vm1, %v1385_v62 }
  0xb1   :  { %1025 = vmatmul.mubr.msk.f32.gmra.mxu0 %vm162_vm1, %v1385_v62  ;;  %976 = vmatprep.mubr.msk.f32.mxu1 %vm1183_vm0, %v1182_v7 }
  0xb2   :  { %1027 = vmatprep.mubr.msk.f32.mxu0 %vm1183_vm0, %v1182_v7 }
  0xb4   :  { %977 = vmatmul.mubr.msk.f32.gmra.mxu1 %vm162_vm1, %v1411_v6 }
  0xb5   :  { %1028 = vmatmul.mubr.msk.f32.gmra.mxu0 %vm162_vm1, %v1411_v6  ;;  %979 = vmatprep.mubr.msk.f32.mxu1 %vm1183_vm0, %v1182_v7 }
  0xb6   :  { %1030 = vmatprep.mubr.msk.f32.mxu0 %vm1183_vm0, %v1182_v7 }
  0xb8   :  { %980 = vmatmul.mubr.msk.f32.gmra.mxu1 %vm162_vm1, %v1090_v12 }
  0xb9   :  { %1031 = vmatmul.mubr.msk.f32.gmra.mxu0 %vm162_vm1, %v1090_v12  ;;  %982 = vmatprep.mubr.msk.f32.mxu1 %vm1183_vm0, %v1182_v7 }
  0xba   :  { %1033 = vmatprep.mubr.msk.f32.mxu0 %vm1183_vm0, %v1182_v7 }
  0xbc   :  { %983 = vmatmul.mubr.msk.f32.gmra.mxu1 %vm162_vm1, %v1094_v16 }
  0xbd   :  { %1034 = vmatmul.mubr.msk.f32.gmra.mxu0 %vm162_vm1, %v1094_v16  ;;  %985 = vmatprep.mubr.msk.f32.mxu1 %vm1183_vm0, %v1182_v7 }
  0xbe   :  { %1036 = vmatprep.mubr.msk.f32.mxu0 %vm1183_vm0, %v1182_v7 }
  0xc0   :  { %986 = vmatmul.mubr.msk.f32.gmra.mxu1 %vm162_vm1, %v1098_v20 }
  0xc1   :  { %1037 = vmatmul.mubr.msk.f32.gmra.mxu0 %vm162_vm1, %v1098_v20  ;;  %988 = vmatprep.mubr.msk.f32.mxu1 %vm1183_vm0, %v1182_v7 }
  0xc2   :  { %1039 = vmatprep.mubr.msk.f32.mxu0 %vm1183_vm0, %v1182_v7 }
  0xc4   :  { %989 = vmatmul.mubr.msk.f32.gmra.mxu1 %vm162_vm1, %v1102_v25 }
  0xc5   :  { %1040 = vmatmul.mubr.msk.f32.gmra.mxu0 %vm162_vm1, %v1102_v25  ;;  %991 = vmatprep.mubr.msk.f32.mxu1 %vm1183_vm0, %v1182_v7 }
  0xc6   :  { %1042 = vmatprep.mubr.msk.f32.mxu0 %vm1183_vm0, %v1182_v7 }
  0xc8   :  { %992 = vmatmul.mubr.msk.f32.gmra.mxu1 %vm162_vm1, %v1376_v58 }
  0xc9   :  { %1043 = vmatmul.mubr.msk.f32.gmra.mxu0 %vm162_vm1, %v1376_v58  ;;  %994 = vmatprep.mubr.msk.f32.mxu1 %vm1183_vm0, %v1182_v7 }
  0xca   :  { %1045 = vmatprep.mubr.msk.f32.mxu0 %vm1183_vm0, %v1182_v7 }
  0xcc   :  { %995 = vmatmul.mubr.msk.f32.gmra.mxu1 %vm162_vm1, %v1403_v3 }
  0xcd   :  { %1046 = vmatmul.mubr.msk.f32.gmra.mxu0 %vm162_vm1, %v1403_v3  ;;  %997 = vmatprep.mubr.msk.f32.mxu1 %vm1183_vm0, %v1182_v7 }
  0xce   :  { %1048 = vmatprep.mubr.msk.f32.mxu0 %vm1183_vm0, %v1182_v7 }
  0xd0   :  { %998 = vmatmul.mubr.msk.f32.gmra.mxu1 %vm162_vm1, %v1425_v10 }
  0xd1   :  { %1049 = vmatmul.mubr.msk.f32.gmra.mxu0 %vm162_vm1, %v1425_v10  ;;  %1000 = vmatprep.mubr.msk.f32.mxu1 %vm1183_vm0, %v1182_v7 }
  0xd2   :  { %1051 = vmatprep.mubr.msk.f32.mxu0 %vm1183_vm0, %v1182_v7 }
  0xd4   :  { %1001 = vmatmul.mubr.msk.f32.gmra.mxu1 %vm162_vm1, %v1442_v14 }
  0xd5   :  { %1052 = vmatmul.mubr.msk.f32.gmra.mxu0 %vm162_vm1, %v1442_v14  ;;  %1003 = vmatprep.mubr.msk.f32.mxu1 %vm1183_vm0, %v1182_v7  ;;  %v1104_v14 = vpop.eup %1103 }
  0xd6   :  { %1054 = vmatprep.mubr.msk.f32.mxu0 %vm1183_vm0, %v1182_v7 }
  0xd8   :  { %1004 = vmatmul.mubr.msk.f32.gmra.mxu1 %vm162_vm1, %v1459_v18 }
  0xd9   :  { %1055 = vmatmul.mubr.msk.f32.gmra.mxu0 %vm162_vm1, %v1459_v18  ;;  %1006 = vmatprep.mubr.msk.f32.mxu1 %vm1183_vm0, %v1182_v7 }
  0xda   :  { %1057 = vmatprep.mubr.msk.f32.mxu0 %vm1183_vm0, %v1182_v7 }
  0xdc   :  { %1007 = vmatmul.mubr.msk.f32.gmra.mxu1 %vm162_vm1, %v1100_v22 }
  0xdd   :  { %1058 = vmatmul.mubr.msk.f32.gmra.mxu0 %vm162_vm1, %v1100_v22 }
 0x150   :  { %v268_v26 = vpop.f32.mrf.mxu0 }
 0x151   :  { %788 = vst.msk [vmem:[%s1774_s7] sm:$0xff] %vm787_vm2, %v268_v26  ;;  %v1106_v26 = vpop.eup %1105 }
 0x152   :  { %v921_v29 = vpop.f32.mrf.mxu0 }
 0x154   :  { %v303_v30 = vpop.f32.mrf.mxu1 }
 0x155   :  { %v273_v31 = vpop.f32.mrf.mxu0  ;;  %795 = vst.msk [vmem:[%s1774_s7 + $0x38] sm:$0xff] %vm787_vm2, %v303_v30 }
 0x156   :  { %789 = vst.msk [vmem:[%s1774_s7 + $0x8] sm:$0xff] %vm787_vm2, %v273_v31  ;;  %v942_v7 = vpop.f32.mrf.mxu1 }
 0x157   :  { %v924_v32 = vpop.f32.mrf.mxu0 }
 0x158   :  { %v308_v33 = vpop.f32.mrf.mxu1 }
 0x159   :  { %v278_v36 = vpop.f32.mrf.mxu0  ;;  %796 = vst.msk [vmem:[%s1774_s7 + $0x40] sm:$0xff] %vm787_vm2, %v308_v33 }
 0x15a   :  { %790 = vst.msk [vmem:[%s1774_s7 + $0x10] sm:$0xff] %vm787_vm2, %v278_v36  ;;  %v945_v37 = vpop.f32.mrf.mxu1 }
 0x15b   :  { %v927_v38 = vpop.f32.mrf.mxu0 }
 0x15c   :  { %v313_v39 = vpop.f32.mrf.mxu1 }
 0x15d   :  { %v283_v42 = vpop.f32.mrf.mxu0  ;;  %797 = vst.msk [vmem:[%s1774_s7 + $0x48] sm:$0xff] %vm787_vm2, %v313_v39  ;;  %v1108_v39 = vpop.eup %1107 }
 0x15e   :  { %791 = vst.msk [vmem:[%s1774_s7 + $0x18] sm:$0xff] %vm787_vm2, %v283_v42  ;;  %v948_v43 = vpop.f32.mrf.mxu1 }
 0x15f   :  { %v930_v44 = vpop.f32.mrf.mxu0 }
 0x160   :  { %v318_v45 = vpop.f32.mrf.mxu1 }
 0x161   :  { %v288_v48 = vpop.f32.mrf.mxu0  ;;  %798 = vst.msk [vmem:[%s1774_s7 + $0x50] sm:$0xff] %vm787_vm2, %v318_v45 }
 0x162   :  { %792 = vst.msk [vmem:[%s1774_s7 + $0x20] sm:$0xff] %vm787_vm2, %v288_v48  ;;  %v951_v49 = vpop.f32.mrf.mxu1 }
 0x163   :  { %v933_v50 = vpop.f32.mrf.mxu0 }
 0x164   :  { %v323_v51 = vpop.f32.mrf.mxu1 }
 0x165   :  { %v293_v52 = vpop.f32.mrf.mxu0  ;;  %799 = vst.msk [vmem:[%s1774_s7 + $0x58] sm:$0xff] %vm787_vm2, %v323_v51 }
 0x166   :  { %793 = vst.msk [vmem:[%s1774_s7 + $0x28] sm:$0xff] %vm787_vm2, %v293_v52  ;;  %v954_v53 = vpop.f32.mrf.mxu1 }
 0x167   :  { %v936_v56 = vpop.f32.mrf.mxu0  ;;  %v1110_v53 = vpop.eup %1109 }
 0x168   :  { %v328_v57 = vpop.f32.mrf.mxu1 }
 0x169   :  { %v298_v58 = vpop.f32.mrf.mxu0  ;;  %800 = vst.msk [vmem:[%s1774_s7 + $0x60] sm:$0xff] %vm787_vm2, %v328_v57 }
 0x16a   :  { %794 = vst.msk [vmem:[%s1774_s7 + $0x30] sm:$0xff] %vm787_vm2, %v298_v58  ;;  %v957_v59 = vpop.f32.mrf.mxu1 }
 0x16b   :  { %v939_v60 = vpop.f32.mrf.mxu0 }
 0x16c   :  { %v404_v61 = vpop.f32.mrf.mxu1 }
 0x16d   :  { %v540_v62 = vpop.f32.mrf.mxu0 }
 0x16e   :  { %v604_v63 = vmul.f32 %v540_v62, %v540_v62  ;;  %v972_v1 = vpop.f32.mrf.mxu1 }
 0x16f   :  { %v1023_v2 = vpop.f32.mrf.mxu0 }
 0x170   :  { %v617_v3 = vmul.f32 %v604_v63, %v1311_v24  ;;  %v409_v4 = vpop.f32.mrf.mxu1  ;;  %v1112_v2 = vpop.eup %1111 }
 0x171   :  { %v545_v5 = vpop.f32.mrf.mxu0 }
 0x172   :  { %v630_v6 = vsub.f32 %v404_v61, %v617_v3  ;;  %v605_v8 = vmul.f32 %v545_v5, %v545_v5  ;;  %v975_v9 = vpop.f32.mrf.mxu1 }
 0x173   :  { %v1026_v10 = vpop.f32.mrf.mxu0 }
 0x174   :  { %v643_v11 = vsub.f32 0.0, %v630_v6  ;;  %v618_v12 = vmul.f32 %v605_v8, %v1318_v28  ;;  %v414_v13 = vpop.f32.mrf.mxu1 }
 0x175   :  { %v550_v15 = vpop.f32.mrf.mxu0 }
 0x176   :  { %v657_v16 = vmul.f32 %v1104_v14, %v643_v11  ;;  %v631_v17 = vsub.f32 %v409_v4, %v618_v12  ;;  %v606_v18 = vmul.f32 %v550_v15, %v550_v15  ;;  %v978_v19 = vpop.f32.mrf.mxu1 }
 0x177   :  { %v1029_v20 = vpop.f32.mrf.mxu0 }
 0x178   :  { %v682_v24 = vmul.f32 1.442695, %v657_v16  ;;  %v644_v21 = vsub.f32 0.0, %v631_v17  ;;  %v619_v22 = vmul.f32 %v606_v18, %v1309_v23  ;;  %v419_v25 = vpop.f32.mrf.mxu1 }
 0x179   :  { %v555_v29 = vpop.f32.mrf.mxu0 }
 0x17a   :  { %1113 = vpow2.f32 %v682_v24  ;;  %v659_v30 = vmul.f32 %v1106_v26, %v644_v21  ;;  %v632_v28 = vsub.f32 %v414_v13, %v619_v22  ;;  %v607_v31 = vmul.f32 %v555_v29, %v555_v29  ;;  %v981_v7 = vpop.f32.mrf.mxu1 }
 0x17b   :  { %v1032_v32 = vpop.f32.mrf.mxu0  ;;  %1115 = vrcp.f32 %v1350_v47 }
 0x17c   :  { %v684_v33 = vmul.f32 1.442695, %v659_v30  ;;  %v645_v36 = vsub.f32 0.0, %v632_v28  ;;  %v620_v37 = vmul.f32 %v607_v31, %v1330_v35  ;;  %v424_v38 = vpop.f32.mrf.mxu1 }
 0x17d   :  { %v560_v42 = vpop.f32.mrf.mxu0 }
 0x17e   :  { %1117 = vpow2.f32 %v684_v33  ;;  %v661_v23 = vmul.f32 %v1108_v39, %v645_v36  ;;  %v633_v43 = vsub.f32 %v419_v25, %v620_v37  ;;  %v608_v44 = vmul.f32 %v560_v42, %v560_v42  ;;  %v984_v45 = vpop.f32.mrf.mxu1 }
 0x17f   :  { %v1035_v48 = vpop.f32.mrf.mxu0  ;;  %1119 = vrcp.f32 %v1367_v55 }
 0x180   :  { %v686_v49 = vmul.f32 1.442695, %v661_v23  ;;  %v646_v50 = vsub.f32 0.0, %v633_v43  ;;  %v621_v51 = vmul.f32 %v608_v44, %v1340_v41  ;;  %v429_v52 = vpop.f32.mrf.mxu1 }
 0x181   :  { %v565_v56 = vpop.f32.mrf.mxu0 }
 0x182   :  { %1121 = vpow2.f32 %v686_v49  ;;  %v663_v35 = vmul.f32 %v1110_v53, %v646_v50  ;;  %v634_v57 = vsub.f32 %v424_v38, %v621_v51  ;;  %v609_v58 = vmul.f32 %v565_v56, %v565_v56  ;;  %v987_v59 = vpop.f32.mrf.mxu1 }
 0x183   :  { %v1038_v60 = vpop.f32.mrf.mxu0  ;;  %1123 = vrcp.f32 %v1316_v27 }
 0x184   :  { %v688_v61 = vmul.f32 1.442695, %v663_v35  ;;  %v647_v62 = vsub.f32 0.0, %v634_v57  ;;  %v622_v63 = vmul.f32 %v609_v58, %v1350_v47  ;;  %v434_v1 = vpop.f32.mrf.mxu1 }
 0x185   :  { %v570_v3 = vpop.f32.mrf.mxu0 }
 0x186   :  { %1125 = vpow2.f32 %v688_v61  ;;  %v665_v41 = vmul.f32 %v1112_v2, %v647_v62  ;;  %v635_v4 = vsub.f32 %v429_v52, %v622_v63  ;;  %v610_v5 = vmul.f32 %v570_v3, %v570_v3  ;;  %v990_v6 = vpop.f32.mrf.mxu1 }
 0x187   :  { %v1639_v8 = vpop.eup %1113  ;;  %1127 = vrcp.f32 %v1328_v34  ;;  %v1041_v9 = vpop.f32.mrf.mxu0 }
 0x188   :  { %v690_v10 = vmul.f32 1.442695, %v665_v41  ;;  %v648_v11 = vsub.f32 0.0, %v635_v4  ;;  %v623_v12 = vmul.f32 %v610_v5, %v1367_v55  ;;  %v709_v47 = vsel %vm708_vm3, %v1639_v8, 0.0  ;;  %v439_v13 = vpop.f32.mrf.mxu1  ;;  %v1116_v14 = vpop.eup %1115 }
 0x189   :  { %v575_v15 = vpop.f32.mrf.mxu0  ;;  %710 = vadd.xlane.f32.xlu1 %v709_v47 }
 0x18a   :  { %1129 = vpow2.f32 %v690_v10  ;;  %v667_v16 = vmul.f32 %v1116_v14, %v648_v11  ;;  %v636_v17 = vsub.f32 %v434_v1, %v623_v12  ;;  %v611_v18 = vmul.f32 %v575_v15, %v575_v15  ;;  %v993_v19 = vpop.f32.mrf.mxu1 }
 0x18b   :  { %v1645_v20 = vpop.eup %1117  ;;  %1131 = vrcp.f32 %v1338_v40  ;;  %v1044_v24 = vpop.f32.mrf.mxu0 }
 0x18c   :  { %v692_v21 = vmul.f32 1.442695, %v667_v16  ;;  %v649_v22 = vsub.f32 0.0, %v636_v17  ;;  %v624_v55 = vmul.f32 %v611_v18, %v1316_v27  ;;  %v712_v25 = vsel %vm708_vm3, %v1645_v20, 0.0  ;;  %v444_v26 = vpop.f32.mrf.mxu1  ;;  %v1120_v29 = vpop.eup %1119 }
 0x18d   :  { %v580_v30 = vpop.f32.mrf.mxu0  ;;  %713 = vadd.xlane.f32.xlu0 %v712_v25 }
 0x18e   :  { %1133 = vpow2.f32 %v692_v21  ;;  %v669_v28 = vmul.f32 %v1120_v29, %v649_v22  ;;  %v637_v31 = vsub.f32 %v439_v13, %v624_v55  ;;  %v612_v7 = vmul.f32 %v580_v30, %v580_v30  ;;  %v996_v32 = vpop.f32.mrf.mxu1 }
 0x18f   :  { %v1651_v33 = vpop.eup %1121  ;;  %1135 = vrcp.f32 %v1348_v46  ;;  %v1047_v36 = vpop.f32.mrf.mxu0 }
 0x190   :  { %v694_v37 = vmul.f32 1.442695, %v669_v28  ;;  %v650_v38 = vsub.f32 0.0, %v637_v31  ;;  %v625_v27 = vmul.f32 %v612_v7, %v1328_v34  ;;  %v715_v39 = vsel %vm708_vm3, %v1651_v33, 0.0  ;;  %v449_v42 = vpop.f32.mrf.mxu1  ;;  %v1124_v23 = vpop.eup %1123 }
 0x191   :  { %v585_v43 = vpop.f32.mrf.mxu0  ;;  %716 = vadd.xlane.f32.xlu0 %v715_v39 }
 0x192   :  { %1137 = vpow2.f32 %v694_v37  ;;  %v671_v44 = vmul.f32 %v1124_v23, %v650_v38  ;;  %v638_v45 = vsub.f32 %v444_v26, %v625_v27  ;;  %v613_v48 = vmul.f32 %v585_v43, %v585_v43  ;;  %v999_v49 = vpop.f32.mrf.mxu1 }
 0x193   :  { %v1657_v50 = vpop.eup %1125  ;;  %1139 = vrcp.f32 %v1365_v54  ;;  %v1050_v51 = vpop.f32.mrf.mxu0 }
 0x194   :  { %v1128_v52 = vpop.eup %1127  ;;  %v696_v53 = vmul.f32 1.442695, %v671_v44  ;;  %v651_v34 = vsub.f32 0.0, %v638_v45  ;;  %v626_v56 = vmul.f32 %v613_v48, %v1338_v40  ;;  %v718_v35 = vsel %vm708_vm3, %v1657_v50, 0.0  ;;  %v454_v57 = vpop.f32.mrf.mxu1 }
 0x195   :  { %v590_v58 = vpop.f32.mrf.mxu0  ;;  %719 = vadd.xlane.f32.xlu1 %v718_v35 }
 0x196   :  { %1141 = vpow2.f32 %v696_v53  ;;  %v673_v59 = vmul.f32 %v1128_v52, %v651_v34  ;;  %v639_v60 = vsub.f32 %v449_v42, %v626_v56  ;;  %v614_v61 = vmul.f32 %v590_v58, %v590_v58  ;;  %v1002_v62 = vpop.f32.mrf.mxu1 }
 0x197   :  { %v1663_v63 = vpop.eup %1129  ;;  %1143 = vrcp.f32 %v1392_v0  ;;  %v1053_v1 = vpop.f32.mrf.mxu0 }
 0x198   :  { %v1132_v2 = vpop.eup %1131  ;;  %v698_v3 = vmul.f32 1.442695, %v673_v59  ;;  %v652_v41 = vsub.f32 0.0, %v639_v60  ;;  %v627_v40 = vmul.f32 %v614_v61, %v1348_v46  ;;  %v721_v4 = vsel %vm708_vm3, %v1663_v63, 0.0  ;;  %v459_v5 = vpop.f32.mrf.mxu1 }
 0x199   :  { %v595_v6 = vpop.f32.mrf.mxu0  ;;  %722 = vadd.xlane.f32.xlu0 %v721_v4 }
 0x19a   :  { %1145 = vpow2.f32 %v698_v3  ;;  %v675_v9 = vmul.f32 %v1132_v2, %v652_v41  ;;  %v640_v10 = vsub.f32 %v454_v57, %v627_v40  ;;  %v615_v11 = vmul.f32 %v595_v6, %v595_v6  ;;  %v1005_v12 = vpop.f32.mrf.mxu1 }
 0x19b   :  { %v1669_v47 = vpop.eup %1133  ;;  %v1056_v13 = vpop.f32.mrf.mxu0 }
 0x19c   :  { %v1136_v14 = vpop.eup %1135  ;;  %v700_v15 = vmul.f32 1.442695, %v675_v9  ;;  %v653_v16 = vsub.f32 0.0, %v640_v10  ;;  %v628_v17 = vmul.f32 %v615_v11, %v1365_v54  ;;  %v724_v46 = vsel %vm708_vm3, %v1669_v47, 0.0  ;;  %v464_v18 = vpop.f32.mrf.mxu1 }
 0x19d   :  { %v600_v19 = vpop.f32.mrf.mxu0  ;;  %725 = vadd.xlane.f32.xlu1 %v724_v46 }
 0x19e   :  { %1147 = vpow2.f32 %v700_v15  ;;  %v677_v24 = vmul.f32 %v1136_v14, %v653_v16  ;;  %v641_v21 = vsub.f32 %v459_v5, %v628_v17  ;;  %v616_v22 = vmul.f32 %v600_v19, %v600_v19  ;;  %v1008_v55 = vpop.f32.mrf.mxu1 }
 0x19f   :  { %v1674_v25 = vpop.eup %1137  ;;  %v1059_v26 = vpop.f32.mrf.mxu0 }
 0x1a0   :  { %v1140_v29 = vpop.eup %1139  ;;  %v702_v30 = vmul.f32 1.442695, %v677_v24  ;;  %v654_v28 = vsub.f32 0.0, %v641_v21  ;;  %v629_v31 = vmul.f32 %v616_v22, %v1392_v0  ;;  %v727_v54 = vsel %vm708_vm3, %v1674_v25, 0.0 }
 0x1a1   :  { %728 = vadd.xlane.f32.xlu0 %v727_v54 }
 0x1a2   :  { %1149 = vpow2.f32 %v702_v30  ;;  %v679_v7 = vmul.f32 %v1140_v29, %v654_v28  ;;  %v642_v32 = vsub.f32 %v464_v18, %v629_v31 }
 0x1a3   :  { %v1679_v36 = vpop.eup %1141 }
 0x1a4   :  { %v1144_v37 = vpop.eup %1143  ;;  %v704_v38 = vmul.f32 1.442695, %v679_v7  ;;  %v655_v27 = vsub.f32 0.0, %v642_v32  ;;  %v730_v39 = vsel %vm708_vm3, %v1679_v36, 0.0 }
 0x1a5   :  { %731 = vadd.xlane.f32.xlu1 %v730_v39 }
 0x1a6   :  { %1151 = vpow2.f32 %v704_v38  ;;  %v681_v42 = vmul.f32 %v1144_v37, %v655_v27 }
 0x1a7   :  { %v1683_v23 = vpop.eup %1145 }
 0x1a8   :  { %v706_v0 = vmul.f32 1.442695, %v681_v42  ;;  %v733_v43 = vsel %vm708_vm3, %v1683_v23, 0.0 }
 0x1a9   :  { %734 = vadd.xlane.f32.xlu0 %v733_v43 }
 0x1aa   :  { %1153 = vpow2.f32 %v706_v0 }
 0x1ab   :  { %v1687_v44 = vpop.eup %1147 }
 0x1ac   :  { %v736_v45 = vsel %vm708_vm3, %v1687_v44, 0.0 }
 0x1ad   :  { %737 = vadd.xlane.f32.xlu1 %v736_v45 }
 0x1af   :  { %v1691_v48 = vpop.eup %1149 }
 0x1b0   :  { %v739_v49 = vsel %vm708_vm3, %v1691_v48, 0.0 }
 0x1b1   :  { %740 = vadd.xlane.f32.xlu0 %v739_v49 }
 0x1b3   :  { %v1695_v51 = vpop.eup %1151 }
 0x1b4   :  { %v742_v52 = vsel %vm708_vm3, %v1695_v51, 0.0 }
 0x1b5   :  { %743 = vadd.xlane.f32.xlu1 %v742_v52 }
 0x1b7   :  { %v1699_v53 = vpop.eup %1153 }
 0x1b8   :  { %v745_v34 = vsel %vm708_vm3, %v1699_v53, 0.0 }
 0x1b9   :  { %746 = vadd.xlane.f32.xlu0 %v745_v34 }
 0x212   :  { %v711_v56 = vpop.xlane.xlu1 %710 }
 0x213   :  { %1155 = vrcp.f32 %v711_v56 }
 0x216   :  { %v714_v35 = vpop.xlane.xlu0 %713 }
 0x217   :  { %1157 = vrcp.f32 %v714_v35 }
 0x21a   :  { %v717_v57 = vpop.xlane.xlu0 %716 }
 0x21b   :  { %1159 = vrcp.f32 %v717_v57 }
 0x21e   :  { %v720_v58 = vpop.xlane.xlu1 %719 }
 0x21f   :  { %1161 = vrcp.f32 %v720_v58 }
 0x220   :  { %v1156_v59 = vpop.eup %1155 }
 0x221   :  { %v749_v60 = vmul.f32 %v1156_v59, %v1639_v8 }
 0x222   :  { %v723_v61 = vpop.xlane.xlu0 %722 }
 0x223   :  { %774 = vst.msk [vmem:[%s1775_s6] sm:$0xff] %vm708_vm3, %v749_v60  ;;  %1163 = vrcp.f32 %v723_v61 }
 0x224   :  { %v1158_v62 = vpop.eup %1157 }
 0x225   :  { %v751_v1 = vmul.f32 %v1158_v62, %v1645_v20 }
 0x226   :  { %v726_v2 = vpop.xlane.xlu1 %725 }
 0x227   :  { %775 = vst.msk [vmem:[%s1775_s6 + $0x8] sm:$0xff] %vm708_vm3, %v751_v1  ;;  %1165 = vrcp.f32 %v726_v2 }
 0x228   :  { %v1160_v3 = vpop.eup %1159 }
 0x229   :  { %v753_v8 = vmul.f32 %v1160_v3, %v1651_v33 }
 0x22a   :  { %v729_v41 = vpop.xlane.xlu0 %728 }
 0x22b   :  { %776 = vst.msk [vmem:[%s1775_s6 + $0x10] sm:$0xff] %vm708_vm3, %v753_v8  ;;  %1167 = vrcp.f32 %v729_v41 }
 0x22c   :  { %v1162_v40 = vpop.eup %1161 }
 0x22d   :  { %v755_v20 = vmul.f32 %v1162_v40, %v1657_v50 }
 0x22e   :  { %v732_v4 = vpop.xlane.xlu1 %731 }
 0x22f   :  { %777 = vst.msk [vmem:[%s1775_s6 + $0x18] sm:$0xff] %vm708_vm3, %v755_v20  ;;  %1169 = vrcp.f32 %v732_v4 }
 0x230   :  { %v1164_v5 = vpop.eup %1163 }
 0x231   :  { %v757_v33 = vmul.f32 %v1164_v5, %v1663_v63 }
 0x232   :  { %v735_v6 = vpop.xlane.xlu0 %734 }
 0x233   :  { %778 = vst.msk [vmem:[%s1775_s6 + $0x20] sm:$0xff] %vm708_vm3, %v757_v33  ;;  %1171 = vrcp.f32 %v735_v6 }
 0x234   :  { %v1166_v9 = vpop.eup %1165 }
 0x235   :  { %v759_v50 = vmul.f32 %v1166_v9, %v1669_v47 }
 0x236   :  { %v738_v10 = vpop.xlane.xlu1 %737 }
 0x237   :  { %779 = vst.msk [vmem:[%s1775_s6 + $0x28] sm:$0xff] %vm708_vm3, %v759_v50  ;;  %1173 = vrcp.f32 %v738_v10 }
 0x238   :  { %v1168_v11 = vpop.eup %1167 }
 0x239   :  { %v761_v63 = vmul.f32 %v1168_v11, %v1674_v25 }
 0x23a   :  { %v741_v12 = vpop.xlane.xlu0 %740 }
 0x23b   :  { %780 = vst.msk [vmem:[%s1775_s6 + $0x30] sm:$0xff] %vm708_vm3, %v761_v63  ;;  %1175 = vrcp.f32 %v741_v12 }
 0x23c   :  { %v1170_v13 = vpop.eup %1169 }
 0x23d   :  { %v763_v47 = vmul.f32 %v1170_v13, %v1679_v36 }
 0x23e   :  { %v744_v14 = vpop.xlane.xlu1 %743 }
 0x23f   :  { %781 = vst.msk [vmem:[%s1775_s6 + $0x38] sm:$0xff] %vm708_vm3, %v763_v47  ;;  %1177 = vrcp.f32 %v744_v14 }
 0x240   :  { %v1172_v15 = vpop.eup %1171 }
 0x241   :  { %v765_v16 = vmul.f32 %v1172_v15, %v1683_v23 }
 0x242   :  { %v747_v17 = vpop.xlane.xlu0 %746 }
 0x243   :  { %782 = vst.msk [vmem:[%s1775_s6 + $0x40] sm:$0xff] %vm708_vm3, %v765_v16  ;;  %1179 = vrcp.f32 %v747_v17 }
 0x244   :  { %v1174_v46 = vpop.eup %1173 }
 0x245   :  { %v767_v18 = vmul.f32 %v1174_v46, %v1687_v44 }
 0x247   :  { %783 = vst.msk [vmem:[%s1775_s6 + $0x48] sm:$0xff] %vm708_vm3, %v767_v18 }
 0x248   :  { %v1176_v19 = vpop.eup %1175 }
 0x249   :  { %v769_v24 = vmul.f32 %v1176_v19, %v1691_v48 }
 0x24b   :  { %784 = vst.msk [vmem:[%s1775_s6 + $0x50] sm:$0xff] %vm708_vm3, %v769_v24 }
 0x24c   :  { %v1178_v21 = vpop.eup %1177 }
 0x24d   :  { %v771_v22 = vmul.f32 %v1178_v21, %v1695_v51 }
 0x24f   :  { %785 = vst.msk [vmem:[%s1775_s6 + $0x58] sm:$0xff] %vm708_vm3, %v771_v22 }
 0x250   :  { %v1180_v55 = vpop.eup %1179 }
 0x251   :  { %v773_v25 = vmul.f32 %v1180_v55, %v1699_v53 }
 0x253   :  { %786 = vst.msk [vmem:[%s1775_s6 + $0x60] sm:$0xff] %vm708_vm3, %v773_v25 }

</bundles_post_ra>
